<compile_context>
chip_gen: v7x
topology: tpu7x:2x2x1
jax: 0.10.0
libtpu: 0.0.40
codegen_flags: <defaults>
</compile_context>

<pallas_src>
import functools

import jax
import jax.numpy as jnp
from jax.experimental import pallas as pl
from jax.experimental.pallas import tpu as pltpu

_EPS = 1e-8            # torch.nn.CosineSimilarity default eps
_LANE = 128            # TPU lane width
_MAX_BLOCK_B = 2048
_MIB = 1024 * 1024


def _round_up(x, m):
    return ((x + m - 1) // m) * m


def _cdiv(a, b):
    return -(-a // b)


def _tpu_budgets():
    """Returns (vmem_limit_cap_bytes, default_per_tile_bytes), generation aware."""
    try:
        cap = int(pltpu.get_tpu_info().vmem_capacity_bytes)
    except Exception:
        cap = 64 * _MIB                      # conservative fallback (v7x per-TC VMEM)
    vmem_cap = cap - 8 * _MIB                # stay well under physical VMEM
    # v7x (<=64 MiB VMEM, ~3.2 TB/s HBM) wants bigger tiles to amortize the ~0.35us
    # per-grid-step overhead; v5e/v6e are already ~85% of roofline at 4 MiB.
    tile_budget = 8 * _MIB if cap <= 64 * _MIB else 4 * _MIB
    return vmem_cap, tile_budget


def _choose_tiles(B, D, itemsize, max_tile_bytes):
    """Pick (block_b, tile_d). Budgets the f32 working set (inputs are upcast in-kernel),
    so bf16 inputs get the same safe tiling as f32."""
    WORK = 4                                  # f32 working-set bytes per element
    sub = max(8, 32 // itemsize)              # sublane granularity for the streamed dtype
    row_bytes = D * WORK

    if sub * row_bytes <= max_tile_bytes:
        # Full feature dim fits in one tile: fused fast path, tile over batch only.
        tile_d = D
        cap_b = min(_MAX_BLOCK_B, (max_tile_bytes // row_bytes) // sub * sub)
    else:
        # Very large D: keep a modest batch tile and tile D in 128-lane multiples
        # (accumulated in-kernel).
        cap_b = 256 if B >= 256 else _round_up(min(B, 256), sub)
        tile_d = (max_tile_bytes // (cap_b * WORK)) // _LANE * _LANE
        tile_d = max(tile_d, _LANE)
        tile_d = min(tile_d, _round_up(D, _LANE))

    # Batch blocking with NO input padding:
    #  * small B: a single block of exactly B rows (block == full dim, no ragged edge).
    #  * otherwise: at least two blocks so v7x's two TensorCores both get work; the last
    #    block may be ragged -- its out-of-range rows only produce output rows that are
    #    dropped at writeback (output array is exactly (B, 1)).
    if B < 2 * sub:
        block_b = B
    else:
        nb = max(2, _cdiv(B, cap_b))
        block_b = _round_up(_cdiv(B, nb), sub)
    return block_b, tile_d


def _fused_kernel(x1_ref, x2_ref, o_ref, *, eps):
    # Whole feature dim resident: three row reductions straight to the output.
    # No scratch accumulators, no init/finalize phases (k == 1 fast path).
    x1 = x1_ref[...].astype(jnp.float32)
    x2 = x2_ref[...].astype(jnp.float32)
    dot = jnp.sum(x1 * x2, axis=1, keepdims=True)
    sq1 = jnp.sum(x1 * x1, axis=1, keepdims=True)
    sq2 = jnp.sum(x2 * x2, axis=1, keepdims=True)
    # torch: sim = x1.x2 / max(||x1||*||x2||, eps); dist = 1 - sim.
    # Exact divide: runs once per row in the epilogue, off the hot path.
    denom = jnp.maximum(jnp.sqrt(sq1) * jnp.sqrt(sq2), eps)
    o_ref[...] = (1.0 - dot / denom).astype(o_ref.dtype)


def _acc_kernel(x1_ref, x2_ref, o_ref, dot_acc, sq1_acc, sq2_acc, *, D, tile_d, eps):
    # Large-D path: accumulate dot / ||x1||^2 / ||x2||^2 over the k ("arbitrary") axis.
    k = pl.program_id(1)

    @pl.when(k == 0)
    def _init():
        dot_acc[...] = jnp.zeros_like(dot_acc)
        sq1_acc[...] = jnp.zeros_like(sq1_acc)
        sq2_acc[...] = jnp.zeros_like(sq2_acc)

    x1 = x1_ref[...].astype(jnp.float32)
    x2 = x2_ref[...].astype(jnp.float32)

    if D % tile_d != 0:
        # Ragged D tail: the wrapper does NOT pad the inputs, so out-of-range feature
        # columns of the last k block hold garbage -- zero them before the reductions.
        # (Batch raggedness needs no mask: those rows are never read back.)
        col = k * tile_d + jax.lax.broadcasted_iota(jnp.int32, x1.shape, 1)
        valid = col < D
        x1 = jnp.where(valid, x1, 0.0)
        x2 = jnp.where(valid, x2, 0.0)

    # Lane-axis reductions lower to VALU vreg adds + one intra-vreg XLU finish per row
    # block -- negligible next to the HBM DMA of the tile.
    dot_acc[...] += jnp.sum(x1 * x2, axis=1, keepdims=True)
    sq1_acc[...] += jnp.sum(x1 * x1, axis=1, keepdims=True)
    sq2_acc[...] += jnp.sum(x2 * x2, axis=1, keepdims=True)

    @pl.when(k == pl.num_programs(1) - 1)
    def _finalize():
        denom = jnp.maximum(jnp.sqrt(sq1_acc[...]) * jnp.sqrt(sq2_acc[...]), eps)
        o_ref[...] = (1.0 - dot_acc[...] / denom).astype(o_ref.dtype)


@functools.partial(jax.jit, static_argnames=("reduction", "max_tile_bytes"))
def cosine_loss(tensor_1, tensor_2, *, reduction="none", max_tile_bytes=None):
    assert tensor_1.shape == tensor_2.shape
    assert tensor_1.dtype == tensor_2.dtype
    assert tensor_1.ndim == 2, "kernel implements the (B, D) case of CosineSimilarity(dim=1)"
    B, D = tensor_1.shape
    in_itemsize = jnp.dtype(tensor_1.dtype).itemsize

    vmem_cap, default_tile = _tpu_budgets()
    tile_budget = default_tile if max_tile_bytes is None else int(max_tile_bytes)
    # Keep 4 input buffers + f32 temporaries under the per-generation VMEM cap.
    tile_budget = max(min(tile_budget, (vmem_cap - 4 * _MIB) // 6), 4096)

    block_b, tile_d = _choose_tiles(B, D, in_itemsize, tile_budget)
    nb = _cdiv(B, block_b)
    nk = _cdiv(D, tile_d)

    # 2 inputs x 2 pipeline buffers (streamed dtype) + f32 in-kernel temporaries + margin,
    # clamped under physical VMEM (v7x: 64 MiB/TC; v5e/v6e: 128 MiB).
    tile_in = block_b * tile_d * in_itemsize
    tile_f32 = block_b * tile_d * 4
    vmem_limit = int(min(vmem_cap, max(32 * _MIB, 4 * tile_in + 2 * tile_f32 + 4 * _MIB)))

    out_shape = jax.ShapeDtypeStruct((B, 1), jnp.float32)

    if nk == 1:
        kernel = functools.partial(_fused_kernel, eps=_EPS)
        grid_spec = pltpu.PrefetchScalarGridSpec(
            num_scalar_prefetch=0,
            grid=(nb,),
            in_specs=[
                pl.BlockSpec((block_b, tile_d), lambda i: (i, 0)),
                pl.BlockSpec((block_b, tile_d), lambda i: (i, 0)),
            ],
            out_specs=pl.BlockSpec((block_b, 1), lambda i: (i, 0)),
        )
        dim_sem = ("parallel",)
    else:
        kernel = functools.partial(_acc_kernel, D=D, tile_d=tile_d, eps=_EPS)
        grid_spec = pltpu.PrefetchScalarGridSpec(
            num_scalar_prefetch=0,
            grid=(nb, nk),
            in_specs=[
                pl.BlockSpec((block_b, tile_d), lambda i, k: (i, k)),
                pl.BlockSpec((block_b, tile_d), lambda i, k: (i, k)),
            ],
            out_specs=pl.BlockSpec((block_b, 1), lambda i, k: (i, 0)),
            scratch_shapes=[
                pltpu.VMEM((block_b, 1), jnp.float32),   # sum(x1*x2)
                pltpu.VMEM((block_b, 1), jnp.float32),   # sum(x1*x1)
                pltpu.VMEM((block_b, 1), jnp.float32),   # sum(x2*x2)
            ],
        )
        dim_sem = ("parallel", "arbitrary")

    out2d = pl.pallas_call(
        kernel,
        out_shape=out_shape,
        grid_spec=grid_spec,
        compiler_params=pltpu.CompilerParams(
            dimension_semantics=dim_sem,
            vmem_limit_bytes=vmem_limit,
        ),
    )(tensor_1, tensor_2)

    # (B,) in the input dtype, matching torch reduction='none' output shape/dtype.
    cosine_distance = out2d[:, 0].astype(tensor_1.dtype)

    if reduction == "none":
        return cosine_distance
    elif reduction == "mean":
        return jnp.mean(cosine_distance)
    elif reduction == "sum":
        return jnp.sum(cosine_distance)
    else:
        raise ValueError(f"unknown reduction: {reduction}")


def _reference(tensor_1, tensor_2, reduction="none"):
    # Pure-JAX reference mirroring torch semantics.
    x1 = tensor_1.astype(jnp.float32)
    x2 = tensor_2.astype(jnp.float32)
    dot = jnp.sum(x1 * x2, axis=1)
    denom = jnp.maximum(jnp.linalg.norm(x1, axis=1) * jnp.linalg.norm(x2, axis=1), _EPS)
    dist = 1.0 - dot / denom
    if reduction == "none":
        return dist
    elif reduction == "mean":
        return jnp.mean(dist)
    return jnp.sum(dist)


if __name__ == "__main__":
    key = jax.random.PRNGKey(0)
    k1, k2 = jax.random.split(key)

    # Small unaligned (B, D): single batch block, full-D fused fast path.
    B, D = 10, 96
    x1 = jax.random.normal(k1, (B, D), dtype=jnp.float32)
    x2 = jax.random.normal(k2, (B, D), dtype=jnp.float32)
    out = cosine_loss(x1, x2, reduction="none")
    jax.block_until_ready(out)
    ref = _reference(x1, x2, "none")
    assert out.shape == (B,)
    assert jnp.allclose(out, ref, atol=2e-3, rtol=2e-3), (out, ref)

    m = cosine_loss(x1, x2, reduction="mean")
    s = cosine_loss(x1, x2, reduction="sum")
    jax.block_until_ready((m, s))
    assert jnp.allclose(m, _reference(x1, x2, "mean"), atol=2e-3, rtol=2e-3)
    assert jnp.allclose(s, _reference(x1, x2, "sum"), atol=2e-2, rtol=2e-3)

    # Ragged batch (>= 2 batch blocks, NO input padding: out-of-range rows are dropped).
    B1, D1 = 33, 300
    y1 = jax.random.normal(k1, (B1, D1), dtype=jnp.float32)
    y2 = jax.random.normal(k2, (B1, D1), dtype=jnp.float32)
    out1 = cosine_loss(y1, y2, reduction="none")
    jax.block_until_ready(out1)
    assert out1.shape == (B1,)
    assert jnp.allclose(out1, _reference(y1, y2, "none"), atol=2e-3, rtol=2e-3)

    # D-accumulation path (forced tiny tile budget), tile_d divides D (no tail mask).
    B2, D2 = 16, 512
    z1 = jax.random.normal(k1, (B2, D2), dtype=jnp.float32)
    z2 = jax.random.normal(k2, (B2, D2), dtype=jnp.float32)
    out2 = cosine_loss(z1, z2, reduction="none", max_tile_bytes=8192)
    jax.block_until_ready(out2)
    assert jnp.allclose(out2, _reference(z1, z2, "none"), atol=2e-3, rtol=2e-3)

    # D-accumulation path with a ragged D tail (in-kernel mask, still no padding).
    B3, D3 = 16, 300
    w1 = jax.random.normal(k1, (B3, D3), dtype=jnp.float32)
    w2 = jax.random.normal(k2, (B3, D3), dtype=jnp.float32)
    out3 = cosine_loss(w1, w2, reduction="none", max_tile_bytes=8192)
    jax.block_until_ready(out3)
    assert jnp.allclose(out3, _reference(w1, w2, "none"), atol=2e-3, rtol=2e-3)

    # bf16 inputs stream as bf16 (half the HBM traffic); f32 accumulation in-kernel.
    b1 = x1.astype(jnp.bfloat16)
    b2 = x2.astype(jnp.bfloat16)
    out4 = cosine_loss(b1, b2, reduction="none")
    jax.block_until_ready(out4)
    assert out4.dtype == jnp.bfloat16
    assert jnp.allclose(out4.astype(jnp.float32), _reference(b1, b2, "none"),
                        atol=3e-2, rtol=3e-2)

    print("KERNEL_OK")
</pallas_src>

<mosaic_0001>
module attributes {stable_mosaic.version = 11 : i64} {
  func.func @_fused_kernel(%arg0: i32, %arg1: memref<10x96xf32, #tpu.memory_space<vmem>>, %arg2: memref<10x96xf32, #tpu.memory_space<vmem>>, %arg3: memref<10x1xf32, #tpu.memory_space<vmem>>) attributes {dimension_semantics = [#tpu.dimension_semantics<parallel>], iteration_bounds = array<i64: 1>, scalar_prefetch = 0 : i64, scratch_operands = 0 : i64, tpu.core_type = #tpu.core_type<tc>, window_params = [{transform_indices = @transform_0, window_bounds = array<i64: 10, 96>}, {transform_indices = @transform_1, window_bounds = array<i64: 10, 96>}, {transform_indices = @transform_2, window_bounds = array<i64: 10, 1>}]} {
    %c0 = arith.constant 0 : index
    %c0_0 = arith.constant 0 : index
    %0 = vector.load %arg1[%c0, %c0_0] : memref<10x96xf32, #tpu.memory_space<vmem>>, vector<10x96xf32>
    %c0_1 = arith.constant 0 : index
    %c0_2 = arith.constant 0 : index
    %1 = vector.load %arg2[%c0_1, %c0_2] : memref<10x96xf32, #tpu.memory_space<vmem>>, vector<10x96xf32>
    %2 = arith.mulf %0, %1 : vector<10x96xf32>
    %cst = arith.constant dense<0.000000e+00> : vector<10xf32>
    %3 = vector.multi_reduction <add>, %2, %cst [1] : vector<10x96xf32> to vector<10xf32>
    %4 = vector.shape_cast %3 : vector<10xf32> to vector<10x1xf32>
    %5 = arith.mulf %0, %0 : vector<10x96xf32>
    %cst_3 = arith.constant dense<0.000000e+00> : vector<10xf32>
    %6 = vector.multi_reduction <add>, %5, %cst_3 [1] : vector<10x96xf32> to vector<10xf32>
    %7 = vector.shape_cast %6 : vector<10xf32> to vector<10x1xf32>
    %8 = arith.mulf %1, %1 : vector<10x96xf32>
    %cst_4 = arith.constant dense<0.000000e+00> : vector<10xf32>
    %9 = vector.multi_reduction <add>, %8, %cst_4 [1] : vector<10x96xf32> to vector<10xf32>
    %10 = vector.shape_cast %9 : vector<10xf32> to vector<10x1xf32>
    %11 = math.sqrt %7 : vector<10x1xf32>
    %12 = math.sqrt %10 : vector<10x1xf32>
    %13 = arith.mulf %11, %12 : vector<10x1xf32>
    %cst_5 = arith.constant 9.99999993E-9 : f32
    %14 = vector.broadcast %cst_5 : f32 to vector<10x1xf32>
    %15 = arith.maximumf %13, %14 : vector<10x1xf32>
    %16 = arith.divf %4, %15 : vector<10x1xf32>
    %cst_6 = arith.constant 1.000000e+00 : f32
    %17 = vector.broadcast %cst_6 : f32 to vector<10x1xf32>
    %18 = arith.subf %17, %16 : vector<10x1xf32>
    %c0_7 = arith.constant 0 : index
    %c0_8 = arith.constant 0 : index
    %19 = vector.load %arg3[%c0_7, %c0_8] : memref<10x1xf32, #tpu.memory_space<vmem>>, vector<10x1xf32>
    tpu.vector_store %arg3[%c0_7, %c0_8], %18 {strides = array<i32>} : memref<10x1xf32, #tpu.memory_space<vmem>>, vector<10x1xf32>,
    return
  }
  func.func @transform_0(%arg0: i32) -> (i32, i32) {
    %c0_i32 = arith.constant 0 : i32
    %c0_i32_0 = arith.constant 0 : i32
    return %arg0, %c0_i32 : i32, i32
  }
  func.func @transform_1(%arg0: i32) -> (i32, i32) {
    %c0_i32 = arith.constant 0 : i32
    %c0_i32_0 = arith.constant 0 : i32
    return %arg0, %c0_i32 : i32, i32
  }
  func.func @transform_2(%arg0: i32) -> (i32, i32) {
    %c0_i32 = arith.constant 0 : i32
    %c0_i32_0 = arith.constant 0 : i32
    return %arg0, %c0_i32 : i32, i32
  }
}

</mosaic_0001>

<bundles_post_ra>
// kernel: cosine_loss.1
= control target key start
LH: loop header
LB: loop body
LE: loop exit
PB: predicated region body
PF: predicated region fallthrough
CT: control target
= control target key end

     0   :  { %7 = vsyncpa [#allocation3], 0  ;;  %s233_s0 = inlined_call_operand.hbm [shape: f32[10,96], index: 0, kind: input, shape index: {}]   ;;  %s234_s1 = inlined_call_operand.hbm [shape: f32[10,96], index: 1, kind: input, shape index: {}]   ;;  %s235_s2 = inlined_call_operand.vmem [shape: f32[10,1], index: 2, kind: output, shape index: {}]  }
   0x1   :  { %8 = vsyncpa [#allocation5], 0  ;;  %s181_s9 = smov [#allocation2]   ;;  %s133_s13 = scalar_lea.hbm %s233_s0, 256 }
   0x2   :  { %s14_s10 = sshll.u32 %s181_s9, 4  ;;  %p134_p0 = scmp.ne.s32.totalorder %s233_s0, %s133_s13  ;;  %s15_s10 = int_to_ptr.vmem [resolvable:$true] %s14_s10 }
   0x3   :  { %p137_p1 = scmp.lt.u32.totalorder %s133_s13, %s233_s0 }
   0x5   :  { %p139_p2 = pnand %p137_p1, %p134_p0 }
   0x7   :  { %142 = shalt.err (!%p139_p2)
}
   0x8   :  { %s143_s18 = scalar_lea.vmem %s15_s10, 256  ;;  %p148_p4 = scmp.lt.s32.totalorder %s15_s10, %s15_s10 }
   0x9   :  { %p144_p3 = scmp.ne.s32.totalorder %s15_s10, %s143_s18  ;;  %p149_p5 = scmp.lt.s32.totalorder %s143_s18, %s143_s18 }
   0xb   :  { %p150_p6 = por %p149_p5, %p148_p4 }
   0xd   :  { %p151_p7 = pnand %p150_p6, %p144_p3 }
   0xf   :  { %154 = shalt.err (!%p151_p7)
}
  0x10   :  { %s182_s19 = smov 128   ;;  %s183_s20 = smov 8  }
  0x11   :  { %20 = dma.hbm_to_vmem [thread:$0]  %s233_s0, 256, %s15_s10, [#allocation3], %s182_s19, %s182_s19, %s183_s20  }
  0x12   :  { %s184_s23 = smov [#allocation4]   ;;  %s155_s27 = scalar_lea.hbm %s234_s1, 256 }
  0x13   :  { %s26_s24 = sshll.u32 %s184_s23, 4  ;;  %p156_p8 = scmp.ne.s32.totalorder %s234_s1, %s155_s27  ;;  %s27_s24 = int_to_ptr.vmem [resolvable:$true] %s26_s24 }
  0x14   :  { %p159_p9 = scmp.lt.u32.totalorder %s155_s27, %s234_s1 }
  0x16   :  { %p161_p10 = pnand %p159_p9, %p156_p8 }
  0x18   :  { %164 = shalt.err (!%p161_p10)
}
  0x19   :  { %s165_s4 = scalar_lea.vmem %s27_s24, 256  ;;  %p170_p12 = scmp.lt.s32.totalorder %s27_s24, %s27_s24 }
  0x1a   :  { %p166_p11 = scmp.ne.s32.totalorder %s27_s24, %s165_s4  ;;  %p171_p13 = scmp.lt.s32.totalorder %s165_s4, %s165_s4 }
  0x1c   :  { %p172_p0 = por %p171_p13, %p170_p12 }
  0x1e   :  { %p173_p1 = pnand %p172_p0, %p166_p11 }
  0x20   :  { %176 = shalt.err (!%p173_p1)
}
  0x21   :  { %32 = dma.hbm_to_vmem [thread:$0]  %s234_s1, 256, %s27_s24, [#allocation5], %s182_s19, %s182_s19, %s183_s20  }
  0x22   :  { %177 = dma.done.wait [#allocation3], 256  }
  0x23   :  { %178 = vsyncadd [#allocation3], 4294967040 }
  0x24   :  { %179 = dma.done.wait [#allocation5], 256  }
  0x25   :  { %180 = vsyncadd [#allocation5], 4294967040  ;;  %v41_v0 = vld [vmem:[#allocation4] sm:$0xff]  ;;  %vm45_vm0 = vcmask 785408   ;;  %v39_v1 = vld [vmem:[#allocation2] sm:$0xff]  ;;  %vm49_vm1 = vcmask 779264  }
  0x26   :  { %v42_v2 = vld [vmem:[#allocation4 + $0x8] sm:$0x3]  ;;  %v61_v3 = vmul.f32 %v41_v0, %v41_v0  ;;  %v53_v4 = vmul.f32 %v39_v1, %v39_v1  ;;  %v40_v6 = vld [vmem:[#allocation2 + $0x8] sm:$0x3]  ;;  %v43_v12 = vmul.f32 %v41_v0, %v39_v1  ;;  %vm107_vm10 = vcmask 7168  }
  0x27   :  { %v62_v5 = vmul.f32 %v42_v2, %v42_v2  ;;  %v54_v7 = vmul.f32 %v40_v6, %v40_v6  ;;  %v44_v13 = vmul.f32 %v42_v2, %v40_v6  ;;  %vm109_vm11 = vcmask 1024  }
  0x28   :  { %v63_v8 = vsel %vm45_vm0, %v61_v3, 0.0  ;;  %v55_v9 = vsel %vm45_vm0, %v53_v4, 0.0  ;;  %v46_v14 = vsel %vm45_vm0, %v43_v12, 0.0 }
  0x29   :  { %64 = vadd.xlane.f32.xlu1 %v63_v8  ;;  %56 = vadd.xlane.f32.xlu0 %v55_v9  ;;  %v66_v10 = vsel %vm49_vm1, %v62_v5, 0.0  ;;  %v58_v11 = vsel %vm49_vm1, %v54_v7, 0.0  ;;  %v50_v15 = vsel %vm49_vm1, %v44_v13, 0.0 }
  0x2d   :  { %67 = vadd.xlane.f32.xlu1 %v66_v10  ;;  %59 = vadd.xlane.f32.xlu0 %v58_v11 }
  0x31   :  { %47 = vadd.xlane.f32.xlu0 %v46_v14  ;;  %51 = vadd.xlane.f32.xlu1 %v50_v15 }
  0xb6   :  { %v65_v16 = vpop.xlane.xlu1 %64  ;;  %v57_v17 = vpop.xlane.xlu0 %56 }
  0xb7   :  { %121 = vrsqrt.f32 %v65_v16  ;;  %vm85_vm2 = vcmp.eq.f32.partialorder %v65_v16, inf  ;;  %v88_v23 = vand.u32 2147483648, %v65_v16  ;;  %vm87_vm3 = vcmp.eq.f32.partialorder %v65_v16, 0.0 }
  0xb8   :  { %123 = vrsqrt.f32 %v57_v17  ;;  %vm71_vm4 = vcmp.eq.f32.partialorder %v57_v17, inf  ;;  %v74_v26 = vand.u32 2147483648, %v57_v17  ;;  %vm73_vm5 = vcmp.eq.f32.partialorder %v57_v17, 0.0 }
  0xba   :  { %v68_v18 = vpop.xlane.xlu1 %67  ;;  %v60_v19 = vpop.xlane.xlu0 %59 }
  0xbb   :  { %125 = vrsqrt.f32 %v68_v18  ;;  %vm92_vm6 = vcmp.eq.f32.partialorder %v68_v18, inf  ;;  %v95_v33 = vand.u32 2147483648, %v68_v18  ;;  %vm94_vm7 = vcmp.eq.f32.partialorder %v68_v18, 0.0 }
  0xbc   :  { %127 = vrsqrt.f32 %v60_v19  ;;  %vm78_vm8 = vcmp.eq.f32.partialorder %v60_v19, inf  ;;  %v81_v37 = vand.u32 2147483648, %v60_v19  ;;  %vm80_vm9 = vcmp.eq.f32.partialorder %v60_v19, 0.0 }
  0xbe   :  { %v48_v44 = vpop.xlane.xlu0 %47  ;;  %v52_v47 = vpop.xlane.xlu1 %51 }
  0xc1   :  { %v122_v20 = vpop.eup %121 }
  0xc2   :  { %v124_v21 = vpop.eup %123  ;;  %v84_v22 = vmul.f32 %v122_v20, %v65_v16 }
  0xc3   :  { %v70_v24 = vmul.f32 %v124_v21, %v57_v17 }
  0xc4   :  { %v86_v25 = vsel %vm85_vm2, %v65_v16, %v84_v22 }
  0xc5   :  { %v126_v27 = vpop.eup %125  ;;  %v72_v28 = vsel %vm71_vm4, %v57_v17, %v70_v24  ;;  %v89_v29 = vsel %vm87_vm3, %v88_v23, %v86_v25 }
  0xc6   :  { %v128_v30 = vpop.eup %127  ;;  %v91_v31 = vmul.f32 %v126_v27, %v68_v18  ;;  %v75_v32 = vsel %vm73_vm5, %v74_v26, %v72_v28 }
  0xc7   :  { %v77_v34 = vmul.f32 %v128_v30, %v60_v19  ;;  %v97_v35 = vmul.f32 %v89_v29, %v75_v32 }
  0xc8   :  { %v93_v36 = vsel %vm92_vm6, %v68_v18, %v91_v31 }
  0xc9   :  { %v79_v38 = vsel %vm78_vm8, %v60_v19, %v77_v34  ;;  %v99_v39 = vmax.f32 %v97_v35, 1e-08  ;;  %v96_v40 = vsel %vm94_vm7, %v95_v33, %v93_v36 }
  0xca   :  { %v82_v41 = vsel %vm80_vm9, %v81_v37, %v79_v38 }
  0xcb   :  { %129 = vrcp.f32 %v99_v39  ;;  %v98_v42 = vmul.f32 %v96_v40, %v82_v41 }
  0xcd   :  { %v100_v43 = vmax.f32 %v98_v42, 1e-08 }
  0xcf   :  { %131 = vrcp.f32 %v100_v43 }
  0xd5   :  { %v130_v45 = vpop.eup %129 }
  0xd6   :  { %v102_v46 = vmul.f32 %v130_v45, %v48_v44 }
  0xd8   :  { %v105_v48 = vsub.f32 1.0, %v102_v46 }
  0xd9   :  { %v132_v49 = vpop.eup %131 }
  0xda   :  { %108 = vst.msk [vmem:[%s235_s2] sm:$0xff] %vm107_vm10, %v105_v48  ;;  %v104_v50 = vmul.f32 %v132_v49, %v52_v47 }
  0xdc   :  { %v106_v51 = vsub.f32 1.0, %v104_v50 }
  0xde   :  { %110 = vst.msk [vmem:[%s235_s2 + $0x8] sm:$0x3] %vm109_vm11, %v106_v51 }
  0xdf   :  { %115 = vsyncpa [#allocation3], 1 }
  0xe0   :  { %116 = vsyncpa [#allocation5], 1 }

</bundles_post_ra>
